<compile_context>
chip_gen: v6e
topology: v6e:2x2x1
jax: 0.10.0
libtpu: 0.0.40
codegen_flags: <defaults>
</compile_context>

<pallas_src>
import math

import jax
import jax.numpy as jnp
from jax.experimental import pallas as pl
from jax.experimental.pallas import tpu as pltpu

LANE = 128


def _round_up(x, m):
    return ((x + m - 1) // m) * m


def _pad_last(x, target):
    pad = target - x.shape[-1]
    if pad == 0:
        return x
    return jnp.pad(x, [(0, 0)] * (x.ndim - 1) + [(0, pad)])


def _pad2(x, rows, cols):
    pr, pc = rows - x.shape[0], cols - x.shape[1]
    if pr == 0 and pc == 0:
        return x
    return jnp.pad(x, ((0, pr), (0, pc)))


def _pick_batch_tile(B, S):
    """Largest divisor of B giving ~<=512 flattened (Bt*S) rows per grid step;
    prefer >=2 grid steps (v7x has 2 TensorCores/chip) when each step still
    feeds >=128 MXU rows."""
    cap = max(1, 512 // max(S, 1))
    feasible = [d for d in range(1, B + 1) if B % d == 0 and d <= cap]
    bt = max(feasible)
    two_step = [d for d in feasible if B // d >= 2 and d * S >= 128]
    if B // bt < 2 and two_step:
        bt = max(two_step)
    return bt


def bahdanau_kernel(values_ref, hidden_ref,
                    w1t_ref, b1_ref, w2t_ref, b2_ref, vt_ref, bv_ref,
                    ctx_ref, attn_ref):
    Bt, S, Fp = values_ref.shape
    Hp = w1t_ref.shape[1]
    Tp = vt_ref.shape[1]
    T = ctx_ref.shape[1]                          # un-padded num_task

    vals = values_ref[...]                        # (Bt, S, Fp)
    vals2d = vals.reshape(Bt * S, Fp)             # one big MXU M dimension

    # W1(values): single (Bt*S, Fp) x (Fp, Hp) GEMM, f32 accumulation.
    h1 = jnp.dot(vals2d, w1t_ref[...],
                 preferred_element_type=jnp.float32) + b1_ref[...]       # (Bt*S, Hp)

    # W2(hidden): hoisted -- once per batch tile, not once per sequence row.
    hid = hidden_ref[...].reshape(Bt, Fp)
    h2 = jnp.dot(hid, w2t_ref[...],
                 preferred_element_type=jnp.float32) + b2_ref[...]       # (Bt, Hp)

    # broadcast the hidden projection over the sequence axis.
    e = jnp.tanh(h1.reshape(Bt, S, Hp) + h2[:, None, :])                 # (Bt, S, Hp)

    # V(e): (Bt*S, Hp) x (Hp, Tp)
    score = jnp.dot(e.reshape(Bt * S, Hp).astype(vt_ref.dtype), vt_ref[...],
                    preferred_element_type=jnp.float32) + bv_ref[...]
    score = score.reshape(Bt, S, Tp)

    # softmax over the sequence axis (PyTorch Softmax(dim=1)); f32 math.
    # TODO(synk): for very long S, lay score out as (Tp, S) so this reduction
    # runs along lanes instead of across sublanes (XLU).
    m = jnp.max(score, axis=1, keepdims=True)
    p = jnp.exp(score - m)
    s = jnp.sum(p, axis=1, keepdims=True)
    r = pl.reciprocal(s, approx=True)             # EUP slot (otherwise idle)
    r = r * (2.0 - s * r)                         # one Newton step -> ~f32 accuracy
    attn = p * r                                  # (Bt, S, Tp)

    attn_ref[...] = attn.astype(attn_ref.dtype)

    # context = values^T @ attn emitted directly as (Bt, T, Fp):
    # batched dot_general contracting S -- no explicit transpose (no XLU op).
    ctx = jax.lax.dot_general(
        attn.astype(vals.dtype), vals,
        dimension_numbers=(((1,), (1,)), ((0,), (0,))),
        preferred_element_type=jnp.float32)       # (Bt, Tp, Fp)
    ctx_ref[...] = ctx[:, :T, :].astype(ctx_ref.dtype)


def bahdanau_attention(hidden_states, values, params, matmul_dtype=jnp.float32):
    """hidden_states: (B, F), values: (B, S, F) -> (ctx (B, T, F), attn (B, S, T))."""
    B, S, F = values.shape
    W1, b1, W2, b2, V, bV = params
    H = W1.shape[0]
    T = V.shape[0]

    # Lane-pad every contraction / output feature dim to 128 so all kernel
    # matmuls and stores are lane-dense; padding is zeros, sliced off after.
    Fp = _round_up(F, LANE)
    Hp = _round_up(H, LANE)
    Tp = _round_up(T, LANE)

    vals_p = _pad_last(values, Fp).astype(matmul_dtype)                    # (B, S, Fp)
    hid_p = _pad_last(hidden_states, Fp).reshape(B, 1, Fp).astype(matmul_dtype)
    w1t = _pad2(W1.T, Fp, Hp).astype(matmul_dtype)                         # (Fp, Hp)
    w2t = _pad2(W2.T, Fp, Hp).astype(matmul_dtype)                         # (Fp, Hp)
    vt = _pad2(V.T, Hp, Tp).astype(matmul_dtype)                           # (Hp, Tp)
    b1_ = _pad_last(b1.reshape(1, H), Hp).astype(jnp.float32)
    b2_ = _pad_last(b2.reshape(1, H), Hp).astype(jnp.float32)
    bv_ = _pad_last(bV.reshape(1, T), Tp).astype(jnp.float32)

    Bt = _pick_batch_tile(B, S)
    num_tiles = B // Bt

    # Explicit VMEM budget: double-buffered pipeline blocks + headroom for the
    # in-kernel temporaries, clamped to v7x's 64 MiB/TensorCore physical cap.
    isz = jnp.dtype(matmul_dtype).itemsize
    block_bytes = ((Bt * S * Fp + Bt * Fp) * isz
                   + (2 * Fp * Hp + Hp * Tp) * isz
                   + (2 * Hp + Tp) * 4
                   + (Bt * T * Fp + Bt * S * Tp) * 4)
    vmem_limit = int(min(max(4 * block_bytes, 32 * 1024 * 1024),
                         64 * 1024 * 1024))

    grid_spec = pltpu.PrefetchScalarGridSpec(
        num_scalar_prefetch=0,
        grid=(num_tiles,),
        in_specs=[
            pl.BlockSpec((Bt, S, Fp), lambda b: (b, 0, 0)),   # values tile
            pl.BlockSpec((Bt, 1, Fp), lambda b: (b, 0, 0)),   # hidden tile
            pl.BlockSpec((Fp, Hp), lambda b: (0, 0)),         # W1^T
            pl.BlockSpec((1, Hp), lambda b: (0, 0)),          # b1
            pl.BlockSpec((Fp, Hp), lambda b: (0, 0)),         # W2^T
            pl.BlockSpec((1, Hp), lambda b: (0, 0)),          # b2
            pl.BlockSpec((Hp, Tp), lambda b: (0, 0)),         # V^T
            pl.BlockSpec((1, Tp), lambda b: (0, 0)),          # bV
        ],
        out_specs=[
            pl.BlockSpec((Bt, T, Fp), lambda b: (b, 0, 0)),   # context (lane-dense Fp)
            pl.BlockSpec((Bt, S, Tp), lambda b: (b, 0, 0)),   # attention (lane-dense Tp)
        ],
    )

    ctx_p, attn_p = pl.pallas_call(
        bahdanau_kernel,
        grid_spec=grid_spec,
        out_shape=(
            jax.ShapeDtypeStruct((B, T, Fp), jnp.float32),
            jax.ShapeDtypeStruct((B, S, Tp), jnp.float32),
        ),
        compiler_params=pltpu.CompilerParams(
            dimension_semantics=("parallel",),    # shards across v7x's 2 TCs
            vmem_limit_bytes=vmem_limit),
    )(vals_p, hid_p, w1t, b1_, w2t, b2_, vt, bv_)

    # strip the lane padding (cheap XLA slices)
    return ctx_p[:, :, :F], attn_p[:, :, :T]


def make_params(key, in_features, hidden_units, num_task):
    ks = jax.random.split(key, 6)

    def u(k, shape, fan_in):
        bound = 1.0 / jnp.sqrt(fan_in)
        return jax.random.uniform(k, shape, jnp.float32, -bound, bound)

    W1 = u(ks[0], (hidden_units, in_features), in_features)
    b1 = u(ks[1], (hidden_units,), in_features)
    W2 = u(ks[2], (hidden_units, in_features), in_features)
    b2 = u(ks[3], (hidden_units,), in_features)
    V = u(ks[4], (num_task, hidden_units), hidden_units)
    bV = u(ks[5], (num_task,), hidden_units)
    return (W1, b1, W2, b2, V, bV)


def reference(hidden_states, values, params):
    W1, b1, W2, b2, V, bV = params
    h = hidden_states[:, None, :]                                        # (B,1,F)
    score = jnp.tanh(values @ W1.T + b1 + h @ W2.T + b2) @ V.T + bV      # (B,S,T)
    attn = jax.nn.softmax(score, axis=1)
    ctx = jnp.einsum('bst,bsf->btf', attn, values)                       # (B,T,F)
    return ctx, attn


if __name__ == "__main__":
    B, S, F, H, T = 2, 8, 32, 32, 4
    key = jax.random.PRNGKey(0)
    k_h, k_v, k_p = jax.random.split(key, 3)
    hidden_states = jax.random.normal(k_h, (B, F), jnp.float32)
    values = jax.random.normal(k_v, (B, S, F), jnp.float32)
    params = make_params(k_p, F, H, T)

    ctx, attn = bahdanau_attention(hidden_states, values, params)
    jax.block_until_ready((ctx, attn))

    ctx_ref, attn_ref = reference(hidden_states, values, params)
    assert ctx.shape == (B, T, F) and attn.shape == (B, S, T)
    assert jnp.allclose(ctx, ctx_ref, atol=1e-5, rtol=1e-5)
    assert jnp.allclose(attn, attn_ref, atol=1e-5, rtol=1e-5)
    print("KERNEL_OK")
</pallas_src>

<mosaic_0001>
module attributes {stable_mosaic.version = 11 : i64} {
  func.func @bahdanau_kernel(%arg0: i32, %arg1: memref<2x8x128xf32, #tpu.memory_space<vmem>>, %arg2: memref<2x1x128xf32, #tpu.memory_space<vmem>>, %arg3: memref<128x128xf32, #tpu.memory_space<vmem>>, %arg4: memref<1x128xf32, #tpu.memory_space<vmem>>, %arg5: memref<128x128xf32, #tpu.memory_space<vmem>>, %arg6: memref<1x128xf32, #tpu.memory_space<vmem>>, %arg7: memref<128x128xf32, #tpu.memory_space<vmem>>, %arg8: memref<1x128xf32, #tpu.memory_space<vmem>>, %arg9: memref<2x4x128xf32, #tpu.memory_space<vmem>>, %arg10: memref<2x8x128xf32, #tpu.memory_space<vmem>>) attributes {dimension_semantics = [#tpu.dimension_semantics<parallel>], iteration_bounds = array<i64: 1>, scalar_prefetch = 0 : i64, scratch_operands = 0 : i64, tpu.core_type = #tpu.core_type<tc>, window_params = [{transform_indices = @transform_0, window_bounds = array<i64: 2, 8, 128>}, {transform_indices = @transform_1, window_bounds = array<i64: 2, 1, 128>}, {pipeline_mode = #tpu.pipeline_mode<synchronous>, transform_indices = @transform_2, window_bounds = array<i64: 128, 128>}, {pipeline_mode = #tpu.pipeline_mode<synchronous>, transform_indices = @transform_3, window_bounds = array<i64: 1, 128>}, {pipeline_mode = #tpu.pipeline_mode<synchronous>, transform_indices = @transform_4, window_bounds = array<i64: 128, 128>}, {pipeline_mode = #tpu.pipeline_mode<synchronous>, transform_indices = @transform_5, window_bounds = array<i64: 1, 128>}, {pipeline_mode = #tpu.pipeline_mode<synchronous>, transform_indices = @transform_6, window_bounds = array<i64: 128, 128>}, {pipeline_mode = #tpu.pipeline_mode<synchronous>, transform_indices = @transform_7, window_bounds = array<i64: 1, 128>}, {transform_indices = @transform_8, window_bounds = array<i64: 2, 4, 128>}, {transform_indices = @transform_9, window_bounds = array<i64: 2, 8, 128>}]} {
    %c0 = arith.constant 0 : index
    %c0_0 = arith.constant 0 : index
    %c0_1 = arith.constant 0 : index
    %0 = vector.load %arg1[%c0, %c0_0, %c0_1] : memref<2x8x128xf32, #tpu.memory_space<vmem>>, vector<2x8x128xf32>
    %1 = vector.shape_cast %0 : vector<2x8x128xf32> to vector<16x128xf32>
    %c0_2 = arith.constant 0 : index
    %c0_3 = arith.constant 0 : index
    %2 = vector.load %arg3[%c0_2, %c0_3] : memref<128x128xf32, #tpu.memory_space<vmem>>, vector<128x128xf32>
    %cst = arith.constant dense<0.000000e+00> : vector<16x128xf32>
    %3 = tpu.matmul %1, %2, %cst {dimension_numbers = #tpu.dot_dimension_numbers<[1], [0], [0], [1], [0, 0, 1, 1], [], []>} : vector<16x128xf32>, vector<128x128xf32>, vector<16x128xf32> -> vector<16x128xf32>
    %c0_4 = arith.constant 0 : index
    %c0_5 = arith.constant 0 : index
    %4 = vector.load %arg4[%c0_4, %c0_5] : memref<1x128xf32, #tpu.memory_space<vmem>>, vector<1x128xf32>
    %5 = vector.broadcast %4 : vector<1x128xf32> to vector<16x128xf32>
    %6 = arith.addf %3, %5 : vector<16x128xf32>
    %c0_6 = arith.constant 0 : index
    %c0_7 = arith.constant 0 : index
    %c0_8 = arith.constant 0 : index
    %7 = vector.load %arg2[%c0_6, %c0_7, %c0_8] : memref<2x1x128xf32, #tpu.memory_space<vmem>>, vector<2x1x128xf32>
    %8 = vector.shape_cast %7 : vector<2x1x128xf32> to vector<2x128xf32>
    %c0_9 = arith.constant 0 : index
    %c0_10 = arith.constant 0 : index
    %9 = vector.load %arg5[%c0_9, %c0_10] : memref<128x128xf32, #tpu.memory_space<vmem>>, vector<128x128xf32>
    %cst_11 = arith.constant dense<0.000000e+00> : vector<2x128xf32>
    %10 = tpu.matmul %8, %9, %cst_11 {dimension_numbers = #tpu.dot_dimension_numbers<[1], [0], [0], [1], [0, 0, 1, 1], [], []>} : vector<2x128xf32>, vector<128x128xf32>, vector<2x128xf32> -> vector<2x128xf32>
    %c0_12 = arith.constant 0 : index
    %c0_13 = arith.constant 0 : index
    %11 = vector.load %arg6[%c0_12, %c0_13] : memref<1x128xf32, #tpu.memory_space<vmem>>, vector<1x128xf32>
    %12 = vector.broadcast %11 : vector<1x128xf32> to vector<2x128xf32>
    %13 = arith.addf %10, %12 : vector<2x128xf32>
    %14 = vector.shape_cast %6 : vector<16x128xf32> to vector<2x8x128xf32>
    %15 = vector.shape_cast %13 : vector<2x128xf32> to vector<2x1x128xf32>
    %16 = vector.broadcast %15 : vector<2x1x128xf32> to vector<2x8x128xf32>
    %17 = arith.addf %14, %16 : vector<2x8x128xf32>
    %18 = math.tanh %17 : vector<2x8x128xf32>
    %19 = vector.shape_cast %18 : vector<2x8x128xf32> to vector<16x128xf32>
    %c0_14 = arith.constant 0 : index
    %c0_15 = arith.constant 0 : index
    %20 = vector.load %arg7[%c0_14, %c0_15] : memref<128x128xf32, #tpu.memory_space<vmem>>, vector<128x128xf32>
    %cst_16 = arith.constant dense<0.000000e+00> : vector<16x128xf32>
    %21 = tpu.matmul %19, %20, %cst_16 {dimension_numbers = #tpu.dot_dimension_numbers<[1], [0], [0], [1], [0, 0, 1, 1], [], []>} : vector<16x128xf32>, vector<128x128xf32>, vector<16x128xf32> -> vector<16x128xf32>
    %c0_17 = arith.constant 0 : index
    %c0_18 = arith.constant 0 : index
    %22 = vector.load %arg8[%c0_17, %c0_18] : memref<1x128xf32, #tpu.memory_space<vmem>>, vector<1x128xf32>
    %23 = vector.broadcast %22 : vector<1x128xf32> to vector<16x128xf32>
    %24 = arith.addf %21, %23 : vector<16x128xf32>
    %25 = vector.shape_cast %24 : vector<16x128xf32> to vector<2x8x128xf32>
    %cst_19 = arith.constant dense<0xFF800000> : vector<2x128xf32>
    %26 = vector.multi_reduction <maximumf>, %25, %cst_19 [1] : vector<2x8x128xf32> to vector<2x128xf32>
    %27 = vector.shape_cast %26 : vector<2x128xf32> to vector<2x1x128xf32>
    %28 = vector.broadcast %27 : vector<2x1x128xf32> to vector<2x8x128xf32>
    %29 = arith.subf %25, %28 : vector<2x8x128xf32>
    %30 = math.exp %29 : vector<2x8x128xf32>
    %cst_20 = arith.constant dense<0.000000e+00> : vector<2x128xf32>
    %31 = vector.multi_reduction <add>, %30, %cst_20 [1] : vector<2x8x128xf32> to vector<2x128xf32>
    %32 = vector.shape_cast %31 : vector<2x128xf32> to vector<2x1x128xf32>
    %33 = tpu.reciprocal %32 {approx = true} : vector<2x1x128xf32> -> vector<2x1x128xf32>
    %34 = arith.mulf %32, %33 : vector<2x1x128xf32>
    %cst_21 = arith.constant 2.000000e+00 : f32
    %35 = vector.broadcast %cst_21 : f32 to vector<2x1x128xf32>
    %36 = arith.subf %35, %34 : vector<2x1x128xf32>
    %37 = arith.mulf %33, %36 : vector<2x1x128xf32>
    %38 = vector.broadcast %37 : vector<2x1x128xf32> to vector<2x8x128xf32>
    %39 = arith.mulf %30, %38 : vector<2x8x128xf32>
    %c0_22 = arith.constant 0 : index
    %c0_23 = arith.constant 0 : index
    %c0_24 = arith.constant 0 : index
    %40 = vector.load %arg10[%c0_22, %c0_23, %c0_24] : memref<2x8x128xf32, #tpu.memory_space<vmem>>, vector<2x8x128xf32>
    tpu.vector_store %arg10[%c0_22, %c0_23, %c0_24], %39 {strides = array<i32>} : memref<2x8x128xf32, #tpu.memory_space<vmem>>, vector<2x8x128xf32>,
    %cst_25 = arith.constant dense<0.000000e+00> : vector<2x128x128xf32>
    %41 = tpu.matmul %39, %0, %cst_25 {dimension_numbers = #tpu.dot_dimension_numbers<[1], [1], [2], [2], [0, 0, 0, 2, 1, 2], [0], [0]>} : vector<2x8x128xf32>, vector<2x8x128xf32>, vector<2x128x128xf32> -> vector<2x128x128xf32>
    %42 = vector.extract_strided_slice %41 {offsets = [0, 0, 0], sizes = [2, 4, 128], strides = [1, 1, 1]} : vector<2x128x128xf32> to vector<2x4x128xf32>
    %c0_26 = arith.constant 0 : index
    %c0_27 = arith.constant 0 : index
    %c0_28 = arith.constant 0 : index
    %43 = vector.load %arg9[%c0_26, %c0_27, %c0_28] : memref<2x4x128xf32, #tpu.memory_space<vmem>>, vector<2x4x128xf32>
    tpu.vector_store %arg9[%c0_26, %c0_27, %c0_28], %42 {strides = array<i32>} : memref<2x4x128xf32, #tpu.memory_space<vmem>>, vector<2x4x128xf32>,
    return
  }
  func.func @transform_0(%arg0: i32) -> (i32, i32, i32) {
    %c0_i32 = arith.constant 0 : i32
    %c0_i32_0 = arith.constant 0 : i32
    %c0_i32_1 = arith.constant 0 : i32
    return %arg0, %c0_i32, %c0_i32_0 : i32, i32, i32
  }
  func.func @transform_1(%arg0: i32) -> (i32, i32, i32) {
    %c0_i32 = arith.constant 0 : i32
    %c0_i32_0 = arith.constant 0 : i32
    %c0_i32_1 = arith.constant 0 : i32
    return %arg0, %c0_i32, %c0_i32_0 : i32, i32, i32
  }
  func.func @transform_2(%arg0: i32) -> (i32, i32) {
    %c0_i32 = arith.constant 0 : i32
    %c0_i32_0 = arith.constant 0 : i32
    %c0_i32_1 = arith.constant 0 : i32
    return %c0_i32, %c0_i32_0 : i32, i32
  }
  func.func @transform_3(%arg0: i32) -> (i32, i32) {
    %c0_i32 = arith.constant 0 : i32
    %c0_i32_0 = arith.constant 0 : i32
    %c0_i32_1 = arith.constant 0 : i32
    return %c0_i32, %c0_i32_0 : i32, i32
  }
  func.func @transform_4(%arg0: i32) -> (i32, i32) {
    %c0_i32 = arith.constant 0 : i32
    %c0_i32_0 = arith.constant 0 : i32
    %c0_i32_1 = arith.constant 0 : i32
    return %c0_i32, %c0_i32_0 : i32, i32
  }
  func.func @transform_5(%arg0: i32) -> (i32, i32) {
    %c0_i32 = arith.constant 0 : i32
    %c0_i32_0 = arith.constant 0 : i32
    %c0_i32_1 = arith.constant 0 : i32
    return %c0_i32, %c0_i32_0 : i32, i32
  }
  func.func @transform_6(%arg0: i32) -> (i32, i32) {
    %c0_i32 = arith.constant 0 : i32
    %c0_i32_0 = arith.constant 0 : i32
    %c0_i32_1 = arith.constant 0 : i32
    return %c0_i32, %c0_i32_0 : i32, i32
  }
  func.func @transform_7(%arg0: i32) -> (i32, i32) {
    %c0_i32 = arith.constant 0 : i32
    %c0_i32_0 = arith.constant 0 : i32
    %c0_i32_1 = arith.constant 0 : i32
    return %c0_i32, %c0_i32_0 : i32, i32
  }
  func.func @transform_8(%arg0: i32) -> (i32, i32, i32) {
    %c0_i32 = arith.constant 0 : i32
    %c0_i32_0 = arith.constant 0 : i32
    %c0_i32_1 = arith.constant 0 : i32
    return %arg0, %c0_i32, %c0_i32_0 : i32, i32, i32
  }
  func.func @transform_9(%arg0: i32) -> (i32, i32, i32) {
    %c0_i32 = arith.constant 0 : i32
    %c0_i32_0 = arith.constant 0 : i32
    %c0_i32_1 = arith.constant 0 : i32
    return %arg0, %c0_i32, %c0_i32_0 : i32, i32, i32
  }
}

</mosaic_0001>

<bundles_post_ra>
// kernel: tpu_custom_call.1
= control target key start
LH: loop header
LB: loop body
LE: loop exit
PB: predicated region body
PF: predicated region fallthrough
CT: control target
= control target key end

     0   :  { %15 = vsyncpa [#allocation3], 0  ;;  %s1586_s0 = inlined_call_operand.hbm [shape: f32[2,8,128], index: 0, kind: input, shape index: {}]   ;;  %s1587_s1 = inlined_call_operand.hbm [shape: f32[2,1,128], index: 1, kind: input, shape index: {}]   ;;  %s1588_s2 = inlined_call_operand.hbm [shape: f32[128,128], index: 2, kind: input, shape index: {}]   ;;  %s1589_s3 = inlined_call_operand.vmem [shape: f32[1,128], index: 3, kind: input, shape index: {}]   ;;  %s1590_s4 = inlined_call_operand.hbm [shape: f32[128,128], index: 4, kind: input, shape index: {}]   ;;  %s1591_s5 = inlined_call_operand.vmem [shape: f32[1,128], index: 5, kind: input, shape index: {}]   ;;  %s1592_s6 = inlined_call_operand.hbm [shape: f32[128,128], index: 6, kind: input, shape index: {}]   ;;  %s1593_s7 = inlined_call_operand.vmem [shape: f32[1,128], index: 7, kind: input, shape index: {}]   ;;  %s1594_s8 = inlined_call_operand.hbm [shape: f32[2,4,128], index: 8, kind: output, shape index: {0}]   ;;  %s1595_s9 = inlined_call_operand.hbm [shape: f32[2,8,128], index: 9, kind: output, shape index: {1}]  }
   0x1   :  { %16 = vsyncpa [#allocation6], 0 }
   0x2   :  { %17 = vsyncpa [#allocation9], 0 }
   0x3   :  { %18 = vsyncpa [#allocation4], 0 }
   0x4   :  { %19 = vsyncpa [#allocation13], 0  ;;  %s1408_s30 = smov [#allocation5]  }
   0x5   :  { %s37_s10 = sshll.u32 %s1408_s30, 4  ;;  %s38_s10 = int_to_ptr.vmem [resolvable:$true] %s37_s10 }
   0x6   :  { %s1266_s11 = scalar_lea.vmem %s38_s10, 32  ;;  %p1271_p1 = scmp.lt.s32.totalorder %s38_s10, %s38_s10 }
   0x7   :  { %p1267_p0 = scmp.ne.s32.totalorder %s38_s10, %s1266_s11  ;;  %p1272_p2 = scmp.lt.s32.totalorder %s1266_s11, %s1266_s11 }
   0x9   :  { %p1273_p3 = por %p1272_p2, %p1271_p1 }
   0xb   :  { %p1274_p4 = pnand %p1273_p3, %p1267_p0 }
   0xd   :  { %1277 = shalt.err (!%p1274_p4)
}
   0xe   :  { %s1409_s12 = smov 16   ;;  %s1410_s13 = smov 1  }
   0xf   :  { %43 = dma.hbm_to_vmem [thread:$0]  %s1587_s1, 32, %s38_s10, [#allocation6], %s1409_s12, %s1409_s12, %s1410_s13  }
  0x10   :  { %s1411_s16 = smov [#allocation8]   ;;  %s1412_s18 = smov [#allocation2]  }
  0x11   :  { %s63_s17 = sshll.u32 %s1411_s16, 4  ;;  %s25_s19 = sshll.u32 %s1412_s18, 4  ;;  %s64_s17 = int_to_ptr.vmem [resolvable:$true] %s63_s17  ;;  %s26_s19 = int_to_ptr.vmem [resolvable:$true] %s25_s19 }
  0x12   :  { %s1286_s20 = scalar_lea.vmem %s64_s17, 2048  ;;  %p1291_p6 = scmp.lt.s32.totalorder %s64_s17, %s64_s17 }
  0x13   :  { %p1287_p5 = scmp.ne.s32.totalorder %s64_s17, %s1286_s20  ;;  %p1292_p7 = scmp.lt.s32.totalorder %s1286_s20, %s1286_s20 }
  0x15   :  { %p1293_p8 = por %p1292_p7, %p1291_p6 }
  0x17   :  { %p1294_p9 = pnand %p1293_p8, %p1287_p5 }
  0x19   :  { %1297 = shalt.err (!%p1294_p9)
}
  0x1a   :  { %s1413_s21 = smov 128   ;;  %s1414_s22 = smov 8  }
  0x1b   :  { %69 = dma.hbm_to_vmem [thread:$0]  %s1590_s4, 2048, %s64_s17, [#allocation9], %s1413_s21, %s1413_s21, %s1414_s22  }
  0x1c   :  { %s1306_s1 = scalar_lea.vmem %s26_s19, 256  ;;  %p1311_p11 = scmp.lt.s32.totalorder %s26_s19, %s26_s19 }
  0x1d   :  { %p1307_p10 = scmp.ne.s32.totalorder %s26_s19, %s1306_s1  ;;  %p1312_p12 = scmp.lt.s32.totalorder %s1306_s1, %s1306_s1 }
  0x1f   :  { %p1313_p13 = por %p1312_p12, %p1311_p11 }
  0x21   :  { %p1314_p0 = pnand %p1313_p13, %p1307_p10 }
  0x23   :  { %1317 = shalt.err (!%p1314_p0)
}
  0x24   :  { %31 = dma.hbm_to_vmem [thread:$0]  %s1586_s0, 256, %s26_s19, [#allocation3], %s1413_s21, %s1413_s21, %s1414_s22  }
  0x25   :  { %s1415_s27 = smov [#allocation7]   ;;  %s1416_s29 = smov [#allocation10]  }
  0x26   :  { %s49_s28 = sshll.u32 %s1415_s27, 4  ;;  %s77_s4 = sshll.u32 %s1416_s29, 4  ;;  %s50_s28 = int_to_ptr.vmem [resolvable:$true] %s49_s28  ;;  %s78_s4 = int_to_ptr.vmem [resolvable:$true] %s77_s4 }
  0x27   :  { %s1326_s30 = scalar_lea.vmem %s50_s28, 2048  ;;  %p1331_p2 = scmp.lt.s32.totalorder %s50_s28, %s50_s28 }
  0x28   :  { %p1327_p1 = scmp.ne.s32.totalorder %s50_s28, %s1326_s30  ;;  %p1332_p3 = scmp.lt.s32.totalorder %s1326_s30, %s1326_s30 }
  0x2a   :  { %p1333_p4 = por %p1332_p3, %p1331_p2 }
  0x2c   :  { %p1334_p5 = pnand %p1333_p4, %p1327_p1 }
  0x2e   :  { %1337 = shalt.err (!%p1334_p5)
}
  0x2f   :  { %55 = dma.hbm_to_vmem [thread:$0]  %s1588_s2, 2048, %s50_s28, [#allocation6], %s1413_s21, %s1413_s21, %s1414_s22  }
  0x30   :  { %s1346_s0 = scalar_lea.vmem %s78_s4, 2048  ;;  %p1351_p7 = scmp.lt.s32.totalorder %s78_s4, %s78_s4 }
  0x31   :  { %p1347_p6 = scmp.ne.s32.totalorder %s78_s4, %s1346_s0  ;;  %p1352_p8 = scmp.lt.s32.totalorder %s1346_s0, %s1346_s0 }
  0x33   :  { %p1353_p9 = por %p1352_p8, %p1351_p7 }
  0x35   :  { %p1354_p10 = pnand %p1353_p9, %p1347_p6 }
  0x37   :  { %1357 = shalt.err (!%p1354_p10)
}
  0x38   :  { %83 = dma.hbm_to_vmem [thread:$0]  %s1592_s6, 2048, %s78_s4, [#allocation9], %s1413_s21, %s1413_s21, %s1414_s22  }
  0x39   :  { %1398 = dma.done.wait [#allocation3], 256  }
  0x3a   :  { %1399 = vsyncadd [#allocation3], 4294967040 }
  0x3b   :  { %1400 = dma.done.wait [#allocation6], 2080  }
  0x3c   :  { %1401 = vsyncadd [#allocation6], 4294965216 }
  0x3d   :  { %1402 = dma.done.wait [#allocation9], 4096  }
  0x3e   :  { %1403 = vsyncadd [#allocation9], 4294963200  ;;  %v1417_v0 = vmov 0.0   ;;  %vm1418_vm0 = vmmov 0   ;;  %v218_v1 = vld [vmem:[#allocation8 + $0x78] sm:$0xff]  ;;  %v217_v3 = vld [vmem:[#allocation8 + $0x70] sm:$0xff]  ;;  %v232_v19 = vlaneseq }
  0x3f   :  { %1106 = vmatprep.subr.mxu1 %v1417_v0  ;;  %1138 = vmatprep.mubr.msk.f32.mxu1 %vm1418_vm0, %v1417_v0  ;;  %v118_v2 = vld [vmem:[#allocation7 + $0x78] sm:$0xff]  ;;  %v117_v4 = vld [vmem:[#allocation7 + $0x70] sm:$0xff]  ;;  %v216_v5 = vld [vmem:[#allocation8 + $0x68] sm:$0xff]  ;;  %v1419_v17 = vmov 1966171168   ;;  %vm523_vm1 = vcmask 64512  }
  0x40   :  { %1107 = vmatpush3.msra.mxu1 %v218_v1  ;;  %1071 = vmatprep.subr.mxu0 %v118_v2  ;;  %v116_v6 = vld [vmem:[#allocation7 + $0x68] sm:$0xff]  ;;  %v215_v7 = vld [vmem:[#allocation8 + $0x60] sm:$0xff]  ;;  %v214_v9 = vld [vmem:[#allocation8 + $0x58] sm:$0xff]  ;;  %v230_v18 = vunpack.c.l.s4 %v1419_v17  ;;  %v1511_v25 = vshrl.u32 %v232_v19, 7 }
  0x41   :  { %1108 = vmatprep.subr.mxu1 %v1417_v0  ;;  %1072 = vmatpush3.msra.mxu0 %v118_v2  ;;  %v115_v8 = vld [vmem:[#allocation7 + $0x60] sm:$0xff]  ;;  %v114_v10 = vld [vmem:[#allocation7 + $0x58] sm:$0xff]  ;;  %v213_v11 = vld [vmem:[#allocation8 + $0x50] sm:$0xff] }
  0x42   :  { %1109 = vmatpush3.msra.mxu1 %v217_v3  ;;  %1073 = vmatprep.subr.mxu0 %v117_v4  ;;  %v113_v12 = vld [vmem:[#allocation7 + $0x50] sm:$0xff]  ;;  %v212_v13 = vld [vmem:[#allocation8 + $0x48] sm:$0xff]  ;;  %v211_v15 = vld [vmem:[#allocation8 + $0x40] sm:$0xff]  ;;  %v231_v24 = vunpack.c.0.s8 %v230_v18 }
  0x43   :  { %1110 = vmatprep.subr.mxu1 %v1417_v0  ;;  %1074 = vmatpush3.msra.mxu0 %v117_v4  ;;  %v112_v14 = vld [vmem:[#allocation7 + $0x48] sm:$0xff]  ;;  %v111_v16 = vld [vmem:[#allocation7 + $0x40] sm:$0xff]  ;;  %v210_v20 = vld [vmem:[#allocation8 + $0x38] sm:$0xff] }
  0x44   :  { %1111 = vmatpush3.msra.mxu1 %v216_v5  ;;  %1075 = vmatprep.subr.mxu0 %v116_v6  ;;  %v110_v21 = vld [vmem:[#allocation7 + $0x38] sm:$0xff]  ;;  %v209_v22 = vld [vmem:[#allocation8 + $0x30] sm:$0xff]  ;;  %v208_v28 = vld [vmem:[#allocation8 + $0x28] sm:$0xff]  ;;  %v1516_v33 = vsub.s32 %v231_v24, %v1511_v25  ;;  %v339_v5 = vsub.s32 0, %v1511_v25 }
  0x45   :  { %1112 = vmatprep.subr.mxu1 %v1417_v0  ;;  %1076 = vmatpush3.msra.mxu0 %v116_v6  ;;  %v109_v23 = vld [vmem:[#allocation7 + $0x30] sm:$0xff]  ;;  %v201_v26 = vld [vmem:[#allocation5] sm:$0x1]  ;;  %v202_v27 = vld [vmem:[#allocation5 + $0x1] sm:$0x1] }
  0x46   :  { %1113 = vmatpush3.msra.mxu1 %v215_v7  ;;  %1077 = vmatprep.subr.mxu0 %v115_v8  ;;  %v108_v29 = vld [vmem:[#allocation7 + $0x28] sm:$0xff]  ;;  %v207_v30 = vld [vmem:[#allocation8 + $0x20] sm:$0xff]  ;;  %v228_v32 = vcombine.low %v201_v26, %v202_v27  ;;  %v206_v34 = vld [vmem:[#allocation8 + $0x18] sm:$0xff] }
  0x47   :  { %1114 = vmatprep.subr.mxu1 %v1417_v0  ;;  %1078 = vmatpush3.msra.mxu0 %v115_v8  ;;  %v107_v31 = vld [vmem:[#allocation7 + $0x20] sm:$0xff]  ;;  %v106_v35 = vld [vmem:[#allocation7 + $0x18] sm:$0xff]  ;;  %v205_v36 = vld [vmem:[#allocation8 + $0x10] sm:$0xff] }
  0x48   :  { %1115 = vmatpush3.msra.mxu1 %v214_v9  ;;  %1079 = vmatprep.subr.mxu0 %v114_v10  ;;  %v105_v37 = vld [vmem:[#allocation7 + $0x10] sm:$0xff]  ;;  %v235_v38 = vrot.slane %v228_v32, %v1516_v33  ;;  %v204_v39 = vld [vmem:[#allocation8 + $0x8] sm:$0xff]  ;;  %v203_v41 = vld [vmem:[#allocation8] sm:$0xff] }
  0x49   :  { %1116 = vmatprep.subr.mxu1 %v1417_v0  ;;  %1080 = vmatpush3.msra.mxu0 %v114_v10  ;;  %v104_v40 = vld [vmem:[#allocation7 + $0x8] sm:$0xff]  ;;  %v103_v43 = vld [vmem:[#allocation7] sm:$0xff]  ;;  %v366_v45 = vld [vmem:[#allocation10 + $0x78] sm:$0xff] }
  0x4a   :  { %1117 = vmatpush3.msra.mxu1 %v213_v11  ;;  %1081 = vmatprep.subr.mxu0 %v113_v12  ;;  %v242_v42 = vrot.slane %v235_v38, %v1516_v33  ;;  %v101_v44 = vld [vmem:[#allocation2] sm:$0xff]  ;;  %v1525_v46 = vld [vmem:[#allocation2 + $0x8] sm:$0xff]  ;;  %v363_v49 = vld [vmem:[#allocation10 + $0x60] sm:$0xff] }
  0x4b   :  { %1118 = vmatprep.subr.mxu1 %v1417_v0  ;;  %1082 = vmatpush3.msra.mxu0 %v113_v12  ;;  %v365_v47 = vld [vmem:[#allocation10 + $0x70] sm:$0xff]  ;;  %v364_v48 = vld [vmem:[#allocation10 + $0x68] sm:$0xff]  ;;  %v362_v50 = vld [vmem:[#allocation10 + $0x58] sm:$0xff] }
  0x4c   :  { %1119 = vmatpush3.msra.mxu1 %v212_v13  ;;  %1083 = vmatprep.subr.mxu0 %v112_v14  ;;  %v361_v51 = vld [vmem:[#allocation10 + $0x50] sm:$0xff]  ;;  %v360_v52 = vld [vmem:[#allocation10 + $0x48] sm:$0xff]  ;;  %v359_v53 = vld [vmem:[#allocation10 + $0x40] sm:$0xff] }
  0x4d   :  { %1120 = vmatprep.subr.mxu1 %v1417_v0  ;;  %1084 = vmatpush3.msra.mxu0 %v112_v14  ;;  %v358_v54 = vld [vmem:[#allocation10 + $0x38] sm:$0xff]  ;;  %v357_v55 = vld [vmem:[#allocation10 + $0x30] sm:$0xff]  ;;  %v356_v56 = vld [vmem:[#allocation10 + $0x28] sm:$0xff] }
  0x4e   :  { %1121 = vmatpush3.msra.mxu1 %v211_v15  ;;  %1085 = vmatprep.subr.mxu0 %v111_v16  ;;  %v355_v57 = vld [vmem:[#allocation10 + $0x20] sm:$0xff]  ;;  %v354_v58 = vld [vmem:[#allocation10 + $0x18] sm:$0xff]  ;;  %v353_v59 = vld [vmem:[#allocation10 + $0x10] sm:$0xff] }
  0x4f   :  { %1122 = vmatprep.subr.mxu1 %v1417_v0  ;;  %1086 = vmatpush3.msra.mxu0 %v111_v16  ;;  %v352_v60 = vld [vmem:[#allocation10 + $0x8] sm:$0xff]  ;;  %v351_v61 = vld [vmem:[#allocation10] sm:$0xff] }
  0x50   :  { %1123 = vmatpush3.msra.mxu1 %v210_v20  ;;  %1087 = vmatprep.subr.mxu0 %v110_v21  ;;  %v950_v62 = vld [vmem:[%s1591_s5] ss:$0 sm:$0xff] }
  0x51   :  { %1124 = vmatprep.subr.mxu1 %v1417_v0  ;;  %1088 = vmatpush3.msra.mxu0 %v110_v21  ;;  %v949_v3 = vld [vmem:[%s1589_s3] ss:$0 sm:$0xff] }
  0x52   :  { %1125 = vmatpush3.msra.mxu1 %v209_v22  ;;  %1089 = vmatprep.subr.mxu0 %v109_v23  ;;  %v951_v18 = vld [vmem:[%s1593_s7] ss:$0 sm:$0xff]  ;;  %s1420_s7 = smov [#allocation12]  }
  0x53   :  { %1126 = vmatprep.subr.mxu1 %v1417_v0  ;;  %1090 = vmatpush3.msra.mxu0 %v109_v23  ;;  %s931_s16 = sshll.u32 %s1420_s7, 4  ;;  %s932_s16 = int_to_ptr.vmem [resolvable:$true] %s931_s16 }
  0x54   :  { %1127 = vmatpush3.msra.mxu1 %v208_v28  ;;  %1091 = vmatprep.subr.mxu0 %v108_v29  ;;  %s1358_s17 = scalar_lea.vmem %s932_s16, 256  ;;  %p1363_p12 = scmp.lt.s32.totalorder %s932_s16, %s932_s16 }
  0x55   :  { %1128 = vmatprep.subr.mxu1 %v1417_v0  ;;  %1092 = vmatpush3.msra.mxu0 %v108_v29  ;;  %p1359_p11 = scmp.ne.s32.totalorder %s932_s16, %s1358_s17  ;;  %p1364_p13 = scmp.lt.s32.totalorder %s1358_s17, %s1358_s17 }
  0x56   :  { %1129 = vmatpush3.msra.mxu1 %v207_v30  ;;  %1093 = vmatprep.subr.mxu0 %v107_v31 }
  0x57   :  { %1130 = vmatprep.subr.mxu1 %v1417_v0  ;;  %1094 = vmatpush3.msra.mxu0 %v107_v31  ;;  %p1365_p0 = por %p1364_p13, %p1363_p12 }
  0x58   :  { %1131 = vmatpush3.msra.mxu1 %v206_v34  ;;  %1095 = vmatprep.subr.mxu0 %v106_v35 }
  0x59   :  { %1132 = vmatprep.subr.mxu1 %v1417_v0  ;;  %1096 = vmatpush3.msra.mxu0 %v106_v35  ;;  %p1366_p1 = pnand %p1365_p0, %p1359_p11 }
  0x5a   :  { %1133 = vmatpush3.msra.mxu1 %v205_v36  ;;  %1097 = vmatprep.subr.mxu0 %v105_v37 }
  0x5b   :  { %1134 = vmatprep.subr.mxu1 %v1417_v0  ;;  %1098 = vmatpush3.msra.mxu0 %v105_v37 }
  0x5c   :  { %1135 = vmatpush3.msra.mxu1 %v204_v39  ;;  %1099 = vmatprep.subr.mxu0 %v104_v40 }
  0x5d   :  { %1136 = vmatprep.subr.mxu1 %v1417_v0  ;;  %1100 = vmatpush3.msra.mxu0 %v104_v40 }
  0x5e   :  { %1137 = vmatpush3.msra.mxu1 %v203_v41  ;;  %1101 = vmatprep.subr.mxu0 %v103_v43 }
  0x5f   :  { %1139 = vmatmul.mubr.f32.vlgmr.msra.gmra.mxu1 %v242_v42  ;;  %1102 = vmatpush3.msra.mxu0 %v103_v43 }
  0x60   :  { %1103 = vmatprep.mubr.f32.mxu0 %v101_v44  ;;  %1141 = vmatprep.subr.mxu0 %v366_v45 }
  0x61   :  { %1104 = vmatmul.mubr.f32.vlgmr.msra.gmra.mxu0 %v1525_v46  ;;  %1176 = vmatprep.subr.mxu1 %v101_v44 }
  0x62   :  { %1142 = vmatpush3.msra.mxu0 %v366_v45  ;;  %1177 = vmatpush3.msra.mxu1 %v101_v44 }
  0x63   :  { %1143 = vmatprep.subr.mxu0 %v365_v47  ;;  %1228 = vmatprep.subr.mxu1 %v1525_v46 }
  0x64   :  { %1144 = vmatpush3.msra.mxu0 %v365_v47 }
  0x65   :  { %1145 = vmatprep.subr.mxu0 %v364_v48 }
  0x66   :  { %1146 = vmatpush3.msra.mxu0 %v364_v48 }
  0x67   :  { %1147 = vmatprep.subr.mxu0 %v363_v49 }
  0x68   :  { %1148 = vmatpush3.msra.mxu0 %v363_v49 }
  0x69   :  { %1149 = vmatprep.subr.mxu0 %v362_v50 }
  0x6a   :  { %1150 = vmatpush3.msra.mxu0 %v362_v50 }
  0x6b   :  { %1151 = vmatprep.subr.mxu0 %v361_v51 }
  0x6c   :  { %1152 = vmatpush3.msra.mxu0 %v361_v51 }
  0x6d   :  { %1153 = vmatprep.subr.mxu0 %v360_v52 }
  0x6e   :  { %1154 = vmatpush3.msra.mxu0 %v360_v52 }
  0x6f   :  { %1155 = vmatprep.subr.mxu0 %v359_v53 }
  0x70   :  { %1156 = vmatpush3.msra.mxu0 %v359_v53 }
  0x71   :  { %1157 = vmatprep.subr.mxu0 %v358_v54 }
  0x72   :  { %1158 = vmatpush3.msra.mxu0 %v358_v54 }
  0x73   :  { %1159 = vmatprep.subr.mxu0 %v357_v55 }
  0x74   :  { %1160 = vmatpush3.msra.mxu0 %v357_v55 }
  0x75   :  { %1161 = vmatprep.subr.mxu0 %v356_v56 }
  0x76   :  { %1162 = vmatpush3.msra.mxu0 %v356_v56 }
  0x77   :  { %1163 = vmatprep.subr.mxu0 %v355_v57 }
  0x78   :  { %1164 = vmatpush3.msra.mxu0 %v355_v57 }
  0x79   :  { %1165 = vmatprep.subr.mxu0 %v354_v58 }
  0x7a   :  { %1166 = vmatpush3.msra.mxu0 %v354_v58 }
  0x7b   :  { %1167 = vmatprep.subr.mxu0 %v353_v59 }
  0x7c   :  { %1168 = vmatpush3.msra.mxu0 %v353_v59 }
  0x7d   :  { %1169 = vmatprep.subr.mxu0 %v352_v60 }
  0x7e   :  { %1170 = vmatpush3.msra.mxu0 %v352_v60 }
  0x7f   :  { %1171 = vmatprep.subr.mxu0 %v351_v61 }
  0x80   :  { %1172 = vmatpush3.msra.mxu0 %v351_v61 }
  0x81   :  { %1202 = vmatprep.subr.mxu0 %v1525_v46 }
 0x11f   :  { %v310_v63 = vpop.f32.mrf.mxu1 }
 0x120   :  { %v311_v0 = vadd.f32 %v950_v62, %v310_v63 }
 0x121   :  { %v1140_v1 = vpop.f32.mrf.mxu1  ;;  %v1105_v2 = vpop.f32.mrf.mxu0 }
 0x122   :  { %v321_v4 = vrot.slane %v311_v0, %v1516_v33  ;;  %v198_v12 = vadd.f32 %v1105_v2, %v949_v3 }
 0x123   :  { %v192_v6 = vpop.f32.mrf.mxu0 }
 0x124   :  { %v322_v7 = vcombine.high %v321_v4, %v321_v4  ;;  %v329_v8 = vrot.slane %v321_v4, %v1516_v33  ;;  %v193_v9 = vadd.f32 %v949_v3, %v192_v6 }
 0x126   :  { %v336_v10 = vrot.slane %v322_v7, %v1516_v33  ;;  %v340_v11 = vrot.slane %v329_v8, %v339_v5 }
 0x128   :  { %v344_v13 = vrot.slane %v336_v10, %v339_v5  ;;  %v347_v14 = vadd.f32 %v340_v11, %v193_v9 }
 0x12a   :  { %v348_v15 = vadd.f32 %v344_v13, %v198_v12  ;;  %1246 = vtanh.f32 %v347_v14 }
 0x12c   :  { %1248 = vtanh.f32 %v348_v15 }
 0x137   :  { %v1247_v16 = vpop.eup %1246 }
 0x138   :  { %1173 = vmatprep.mubr.f32.mxu0 %v1247_v16 }
 0x139   :  { %v1249_v17 = vpop.eup %1248 }
 0x13a   :  { %1174 = vmatmul.mubr.f32.vlgmr.msra.gmra.mxu0 %v1249_v17 }
 0x13b   :  { %1203 = vmatpush3.msra.mxu0 %v1525_v46 }
 0x1fa   :  { %v1175_v19 = vpop.f32.mrf.mxu0 }
 0x1fb   :  { %v446_v20 = vadd.f32 %v1175_v19, %v951_v18 }
 0x1fc   :  { %v440_v21 = vpop.f32.mrf.mxu0 }
 0x1fd   :  { %v455_v22 = vrot.slane %v446_v20, 4  ;;  %v441_v23 = vadd.f32 %v951_v18, %v440_v21 }
 0x1ff   :  { %v456_v24 = vmax.f32 %v446_v20, %v455_v22  ;;  %v449_v25 = vrot.slane %v441_v23, 4 }
 0x201   :  { %v457_v26 = vrot.slane %v456_v24, 2  ;;  %v450_v27 = vmax.f32 %v441_v23, %v449_v25 }
 0x203   :  { %v458_v28 = vmax.f32 %v456_v24, %v457_v26  ;;  %v451_v29 = vrot.slane %v450_v27, 2 }
 0x205   :  { %v459_v30 = vrot.slane %v458_v28, 1  ;;  %v452_v31 = vmax.f32 %v450_v27, %v451_v29 }
 0x207   :  { %v460_v32 = vmax.f32 %v458_v28, %v459_v30  ;;  %v453_v33 = vrot.slane %v452_v31, 1 }
 0x209   :  { %v462_v34 = vsub.f32 %v446_v20, %v460_v32  ;;  %v454_v35 = vmax.f32 %v452_v31, %v453_v33 }
 0x20b   :  { %v465_v36 = vmul.f32 1.442695, %v462_v34  ;;  %v461_v37 = vsub.f32 %v441_v23, %v454_v35 }
 0x20d   :  { %1250 = vpow2.f32 %v465_v36  ;;  %v463_v38 = vmul.f32 1.442695, %v461_v37 }
 0x20f   :  { %1252 = vpow2.f32 %v463_v38 }
 0x21a   :  { %v1251_v39 = vpop.eup %1250 }
 0x21b   :  { %v473_v40 = vrot.slane %v1251_v39, 4 }
 0x21c   :  { %v1253_v41 = vpop.eup %1252 }
 0x21d   :  { %v467_v42 = vrot.slane %v1253_v41, 4  ;;  %v474_v43 = vadd.f32 %v1251_v39, %v473_v40 }
 0x21f   :  { %v468_v44 = vadd.f32 %v1253_v41, %v467_v42  ;;  %v475_v45 = vrot.slane %v474_v43, 2 }
 0x221   :  { %v469_v47 = vrot.slane %v468_v44, 2  ;;  %v476_v48 = vadd.f32 %v475_v45, %v474_v43 }
 0x223   :  { %v470_v49 = vadd.f32 %v469_v47, %v468_v44  ;;  %v477_v50 = vrot.slane %v476_v48, 1 }
 0x225   :  { %v471_v51 = vrot.slane %v470_v49, 1  ;;  %v478_v52 = vadd.f32 %v477_v50, %v476_v48 }
 0x227   :  { %v472_v53 = vadd.f32 %v471_v51, %v470_v49  ;;  %1254 = vrcp.f32 %v478_v52 }
 0x229   :  { %1256 = vrcp.f32 %v472_v53 }
 0x234   :  { %v1255_v54 = vpop.eup %1254 }
 0x235   :  { %v482_v55 = vmul.f32 %v1255_v54, %v478_v52 }
 0x236   :  { %v1257_v56 = vpop.eup %1256 }
 0x237   :  { %v481_v57 = vmul.f32 %v1257_v56, %v472_v53  ;;  %v484_v58 = vsub.f32 2.0, %v482_v55 }
 0x239   :  { %v483_v59 = vsub.f32 2.0, %v481_v57  ;;  %v486_v60 = vmul.f32 %v1255_v54, %v484_v58 }
 0x23b   :  { %v485_v61 = vmul.f32 %v1257_v56, %v483_v59  ;;  %v488_v62 = vmul.f32 %v1251_v39, %v486_v60 }
 0x23d   :  { %v487_v63 = vmul.f32 %v1253_v41, %v485_v61  ;;  %490 = vst [vmem:[#allocation12 + $0x8] sm:$0xff] %v488_v62 }
 0x23f   :  { %491 = vxpose.xlu0.b32.start.end [1/1] (short) %v487_v63, 128  ;;  %489 = vst [vmem:[#allocation12] sm:$0xff] %v487_v63 }
 0x27c   :  { %702 = vxpose.xlu0.b32.start.end [1/1] (short) %v488_v62, 128 }
 0x2bb   :  { %v507_v0 = vpop.trf.xlu0 }
 0x2bc   :  { %1178 = vmatprep.mubr.msk.f32.mxu1 %vm523_vm1, %v507_v0 }
 0x2bf   :  { %v508_v1 = vpop.trf.xlu0 }
 0x2c0   :  { %1179 = vmatmul.mubr.msk.f32.vlgmr.msra.gmra.mxu1 %vm523_vm1, %v508_v1 }
 0x2c1   :  { %1229 = vmatpush3.msra.mxu1 %v1525_v46 }
 0x2c3   :  { %v509_v2 = vpop.trf.xlu0 }
 0x2c4   :  { %1181 = vmatprep.mubr.msk.f32.mxu1 %vm523_vm1, %v509_v2 }
 0x2c7   :  { %v510_v3 = vpop.trf.xlu0 }
 0x2c8   :  { %1182 = vmatmul.mubr.msk.f32.gmra.mxu1 %vm523_vm1, %v510_v3 }
 0x2cb   :  { %v511_v4 = vpop.trf.xlu0 }
 0x2cc   :  { %1184 = vmatprep.mubr.msk.f32.mxu1 %vm523_vm1, %v511_v4 }
 0x2cf   :  { %v512_v5 = vpop.trf.xlu0 }
 0x2d0   :  { %1185 = vmatmul.mubr.msk.f32.gmra.mxu1 %vm523_vm1, %v512_v5 }
 0x2d3   :  { %v513_v6 = vpop.trf.xlu0 }
 0x2d4   :  { %1187 = vmatprep.mubr.msk.f32.mxu1 %vm523_vm1, %v513_v6 }
 0x2d7   :  { %v514_v7 = vpop.trf.xlu0 }
 0x2d8   :  { %1188 = vmatmul.mubr.msk.f32.gmra.mxu1 %vm523_vm1, %v514_v7 }
 0x2db   :  { %v515_v8 = vpop.trf.xlu0 }
 0x2dc   :  { %1190 = vmatprep.mubr.msk.f32.mxu1 %vm523_vm1, %v515_v8 }
 0x2df   :  { %v516_v46 = vpop.trf.xlu0 }
 0x2e0   :  { %1191 = vmatmul.mubr.msk.f32.gmra.mxu1 %vm523_vm1, %v516_v46 }
 0x2e3   :  { %v517_v9 = vpop.trf.xlu0 }
 0x2e4   :  { %1193 = vmatprep.mubr.msk.f32.mxu1 %vm523_vm1, %v517_v9 }
 0x2e7   :  { %v518_v10 = vpop.trf.xlu0 }
 0x2e8   :  { %1194 = vmatmul.mubr.msk.f32.gmra.mxu1 %vm523_vm1, %v518_v10 }
 0x2eb   :  { %v519_v11 = vpop.trf.xlu0 }
 0x2ec   :  { %1196 = vmatprep.mubr.msk.f32.mxu1 %vm523_vm1, %v519_v11 }
 0x2ef   :  { %v520_v12 = vpop.trf.xlu0 }
 0x2f0   :  { %1197 = vmatmul.mubr.msk.f32.gmra.mxu1 %vm523_vm1, %v520_v12 }
 0x2f3   :  { %v521_v13 = vpop.trf.xlu0 }
 0x2f4   :  { %1199 = vmatprep.mubr.msk.f32.mxu1 %vm523_vm1, %v521_v13 }
 0x2f7   :  { %v522_v14 = vpop.trf.xlu0 }
 0x2f8   :  { %1200 = vmatmul.mubr.msk.f32.gmra.mxu1 %vm523_vm1, %v522_v14 }
 0x2fb   :  { %v718_v15 = vpop.trf.xlu0 }
 0x2fc   :  { %1204 = vmatprep.mubr.msk.f32.mxu0 %vm523_vm1, %v718_v15 }
 0x2ff   :  { %v719_v16 = vpop.trf.xlu0 }
 0x300   :  { %1205 = vmatmul.mubr.msk.f32.vlgmr.msra.gmra.mxu0 %vm523_vm1, %v719_v16 }
 0x303   :  { %v720_v17 = vpop.trf.xlu0 }
 0x304   :  { %1207 = vmatprep.mubr.msk.f32.mxu0 %vm523_vm1, %v720_v17 }
 0x307   :  { %v721_v18 = vpop.trf.xlu0 }
 0x308   :  { %1208 = vmatmul.mubr.msk.f32.gmra.mxu0 %vm523_vm1, %v721_v18 }
 0x30b   :  { %v722_v19 = vpop.trf.xlu0 }
 0x30c   :  { %1210 = vmatprep.mubr.msk.f32.mxu0 %vm523_vm1, %v722_v19 }
 0x30f   :  { %v723_v20 = vpop.trf.xlu0 }
 0x310   :  { %1211 = vmatmul.mubr.msk.f32.gmra.mxu0 %vm523_vm1, %v723_v20 }
 0x313   :  { %v724_v21 = vpop.trf.xlu0 }
 0x314   :  { %1213 = vmatprep.mubr.msk.f32.mxu0 %vm523_vm1, %v724_v21 }
 0x317   :  { %v725_v22 = vpop.trf.xlu0 }
 0x318   :  { %1214 = vmatmul.mubr.msk.f32.gmra.mxu0 %vm523_vm1, %v725_v22 }
 0x31b   :  { %v726_v23 = vpop.trf.xlu0 }
 0x31c   :  { %1216 = vmatprep.mubr.msk.f32.mxu1 %vm523_vm1, %v726_v23 }
 0x31f   :  { %v727_v24 = vpop.trf.xlu0 }
 0x320   :  { %1217 = vmatmul.mubr.msk.f32.vlgmr.msra.gmra.mxu1 %vm523_vm1, %v727_v24 }
 0x323   :  { %v728_v25 = vpop.trf.xlu0 }
 0x324   :  { %1219 = vmatprep.mubr.msk.f32.mxu1 %vm523_vm1, %v728_v25 }
 0x327   :  { %v729_v26 = vpop.trf.xlu0 }
 0x328   :  { %1220 = vmatmul.mubr.msk.f32.gmra.mxu1 %vm523_vm1, %v729_v26 }
 0x32b   :  { %v730_v27 = vpop.trf.xlu0 }
 0x32c   :  { %1222 = vmatprep.mubr.msk.f32.mxu1 %vm523_vm1, %v730_v27 }
 0x32f   :  { %v731_v28 = vpop.trf.xlu0 }
 0x330   :  { %1223 = vmatmul.mubr.msk.f32.gmra.mxu1 %vm523_vm1, %v731_v28 }
 0x333   :  { %v732_v29 = vpop.trf.xlu0 }
 0x334   :  { %1225 = vmatprep.mubr.msk.f32.mxu1 %vm523_vm1, %v732_v29 }
 0x337   :  { %v733_v30 = vpop.trf.xlu0 }
 0x338   :  { %1226 = vmatmul.mubr.msk.f32.gmra.mxu1 %vm523_vm1, %v733_v30 }
 0x339   :  { %1369 = shalt.err (!%p1366_p1)
}
 0x33a   :  { %937 = dma.vmem_to_hbm [thread:$0]  %s932_s16, 256, %s1595_s9, [#allocation13], %s1413_s21, %s1413_s21, %s1414_s22  }
 0x33b   :  { %s1421_s20 = smov [#allocation11]  }
 0x33c   :  { %s919_s23 = sshll.u32 %s1421_s20, 4  ;;  %s920_s23 = int_to_ptr.vmem [resolvable:$true] %s919_s23 }
 0x33d   :  { %s1378_s9 = scalar_lea.vmem %s920_s23, 128  ;;  %p1383_p3 = scmp.lt.s32.totalorder %s920_s23, %s920_s23 }
 0x33e   :  { %p1379_p2 = scmp.ne.s32.totalorder %s920_s23, %s1378_s9  ;;  %p1384_p4 = scmp.lt.s32.totalorder %s1378_s9, %s1378_s9 }
 0x340   :  { %p1385_p5 = por %p1384_p4, %p1383_p3 }
 0x342   :  { %p1386_p6 = pnand %p1385_p5, %p1379_p2 }
 0x380   :  { %v1180_v31 = vpop.f32.mrf.mxu1 }
 0x382   :  { %v638_v32 = vpop.f32.mrf.mxu1 }
 0x383   :  { %912 = vst [vmem:[#allocation11] sm:$0xf] %v638_v32 }
 0x388   :  { %v1183_v33 = vpop.f32.mrf.mxu1 }
 0x38a   :  { %v647_v34 = vpop.f32.mrf.mxu1 }
 0x390   :  { %v1186_v35 = vpop.f32.mrf.mxu1 }
 0x392   :  { %v655_v36 = vpop.f32.mrf.mxu1 }
 0x398   :  { %v1189_v37 = vpop.f32.mrf.mxu1 }
 0x39a   :  { %v663_v38 = vpop.f32.mrf.mxu1 }
 0x3a0   :  { %v1192_v39 = vpop.f32.mrf.mxu1 }
 0x3a2   :  { %v671_v40 = vpop.f32.mrf.mxu1 }
 0x3a8   :  { %v1195_v41 = vpop.f32.mrf.mxu1 }
 0x3aa   :  { %v679_v42 = vpop.f32.mrf.mxu1 }
 0x3b0   :  { %v1198_v43 = vpop.f32.mrf.mxu1 }
 0x3b2   :  { %v687_v44 = vpop.f32.mrf.mxu1 }
 0x3b8   :  { %v1201_v45 = vpop.f32.mrf.mxu1 }
 0x3ba   :  { %v695_v47 = vpop.f32.mrf.mxu1 }
 0x3c0   :  { %v1206_v48 = vpop.f32.mrf.mxu0 }
 0x3c2   :  { %v848_v49 = vpop.f32.mrf.mxu0 }
 0x3c3   :  { %913 = vst [vmem:[#allocation11 + $0x4] sm:$0xf] %v848_v49 }
 0x3c4   :  { %1389 = shalt.err (!%p1386_p6)
}
 0x3c5   :  { %s1422_s21 = smov 64   ;;  %s1423_s22 = smov 4  }
 0x3c6   :  { %925 = dma.vmem_to_hbm [thread:$0]  %s920_s23, 128, %s1594_s8, [#allocation4], %s1422_s21, %s1422_s21, %s1423_s22  }
 0x3c8   :  { %v1209_v50 = vpop.f32.mrf.mxu0 }
 0x3ca   :  { %v857_v51 = vpop.f32.mrf.mxu0 }
 0x3d0   :  { %v1212_v52 = vpop.f32.mrf.mxu0 }
 0x3d2   :  { %v865_v53 = vpop.f32.mrf.mxu0 }
 0x3d8   :  { %v1215_v54 = vpop.f32.mrf.mxu0 }
 0x3da   :  { %v873_v55 = vpop.f32.mrf.mxu0 }
 0x3e0   :  { %v1218_v56 = vpop.f32.mrf.mxu1 }
 0x3e2   :  { %v881_v57 = vpop.f32.mrf.mxu1 }
 0x3e8   :  { %v1221_v58 = vpop.f32.mrf.mxu1 }
 0x3ea   :  { %v889_v59 = vpop.f32.mrf.mxu1 }
 0x3f0   :  { %v1224_v60 = vpop.f32.mrf.mxu1 }
 0x3f2   :  { %v897_v61 = vpop.f32.mrf.mxu1 }
 0x3f8   :  { %v1227_v62 = vpop.f32.mrf.mxu1 }
 0x3fa   :  { %v905_v63 = vpop.f32.mrf.mxu1 }
 0x3fb   :  { %1404 = dma.done.wait [#allocation4], 128  }
 0x3fc   :  { %1405 = vsyncadd [#allocation4], 4294967168 }
 0x3fd   :  { %1406 = dma.done.wait [#allocation13], 256  }
 0x3fe   :  { %1407 = vsyncadd [#allocation13], 4294967040 }
 0x3ff   :  { %944 = vsyncpa [#allocation3], 1 }
 0x400   :  { %945 = vsyncpa [#allocation6], 1 }
 0x401   :  { %946 = vsyncpa [#allocation9], 1 }
 0x402   :  { %947 = vsyncpa [#allocation4], 1 }
 0x403   :  { %948 = vsyncpa [#allocation13], 1 }

</bundles_post_ra>
